<compile_context>
chip_gen: v6e
topology: v6e:2x2x1
jax: 0.10.0
libtpu: 0.0.40
codegen_flags: <defaults>
</compile_context>

<pallas_src>
import jax
import jax.numpy as jnp
from jax.experimental import pallas as pl
from jax.experimental.pallas import tpu as pltpu

LN_EPS = 1e-5


def _round_up(x: int, m: int) -> int:
    return ((x + m - 1) // m) * m


def adaln_kernel(a_ref, s_ref, gamma_ref, bias_ref, wcat_ref, o_ref):
    a = a_ref[...].astype(jnp.float32)
    s = s_ref[...].astype(jnp.float32)
    c = a.shape[-1]

    # LayerNorm(a), elementwise_affine=False. Center once, reuse for variance.
    a_c = a - jnp.mean(a, axis=-1, keepdims=True)
    a_ln = a_c * jax.lax.rsqrt(jnp.mean(a_c * a_c, axis=-1, keepdims=True) + LN_EPS)

    # LayerNorm(s), weight only (no bias).
    s_c = s - jnp.mean(s, axis=-1, keepdims=True)
    s_ln = s_c * jax.lax.rsqrt(jnp.mean(s_c * s_c, axis=-1, keepdims=True) + LN_EPS)
    s_ln = s_ln * gamma_ref[...].astype(jnp.float32)

    # Single fused matmul: [tm, c] @ [c, 2c] -> [gate_logits | skip].
    # Operand precision follows the (pre-fused) weight dtype.
    w = wcat_ref[...]
    if w.dtype == jnp.bfloat16:
        lhs = s_ln.astype(jnp.bfloat16)
    else:
        lhs = s_ln
        w = w.astype(jnp.float32)
    y = jnp.dot(lhs, w, preferred_element_type=jnp.float32)

    gate = jax.nn.sigmoid(y[:, :c] + bias_ref[...].astype(jnp.float32))
    skip = y[:, c:]
    o_ref[...] = (gate * a_ln + skip).astype(o_ref.dtype)


def fuse_adaln_weights(w_s, w_nb, *, mxu_bf16=False):
    """Fuse the two [c, c] projections ((in, out) layout = PyTorch weight^T)
    into one [c, 2c] matrix. Call ONCE at parameter-init time, not per
    forward call (the concat is an extra HBM pass)."""
    w_cat = jnp.concatenate([w_s, w_nb], axis=1)
    if mxu_bf16:
        w_cat = w_cat.astype(jnp.bfloat16)  # v6e/v7x: full-rate MXU, half DMA
    return w_cat


def adaln_pallas(a, s, gamma_s, b_s, w_cat, *, tm=None):
    """a, s: [..., c_s]. gamma_s, b_s: [c_s]. w_cat: [c_s, 2*c_s] pre-fused
    weight from fuse_adaln_weights. Output has a.dtype and a's shape."""
    orig_shape = a.shape
    c = orig_shape[-1]
    a2 = a.reshape(-1, c)
    s2 = s.reshape(-1, c)
    n = a2.shape[0]

    a_item = jnp.dtype(a.dtype).itemsize
    s_item = jnp.dtype(s.dtype).itemsize
    w_item = jnp.dtype(w_cat.dtype).itemsize

    # Row tile: target ~1 MiB per input block DMA, clamped to [256, 2048] and
    # never larger than the (sublane-rounded) row count.
    if tm is None:
        tm = (1 << 20) // (c * max(a_item, s_item))
        tm = min(max(_round_up(tm, 8), 256), 2048)
    tm = max(8, min(_round_up(tm, 8), _round_up(n, 8)))

    grid = (pl.cdiv(n, tm),)  # ragged last block handled by Pallas masking

    gamma2 = gamma_s.reshape(1, c)
    bias2 = b_s.reshape(1, c)

    row_spec = pl.BlockSpec((tm, c), lambda i: (i, 0))
    # Grid-invariant operands: single-buffered (constant index_map -> no
    # overlap to gain from double-buffering; frees VMEM for bigger tm).
    vec_spec = pl.BlockSpec((1, c), lambda i: (0, 0), pipeline_mode=pl.Buffered(1))
    mat_spec = pl.BlockSpec((c, 2 * c), lambda i: (0, 0), pipeline_mode=pl.Buffered(1))
    # TODO(synk): for very large c_s (w_cat alone > ~48 MiB) tile the 2c output
    # dim / K dim instead of keeping the whole fused weight resident.

    # VMEM budget: 3 row blocks (a, s, out) double-buffered + resident weight
    # + gamma/bias, with headroom; capped below v7x's 64 MiB per TensorCore.
    blk_bytes = tm * c * (a_item + s_item + a_item)
    w_bytes = c * 2 * c * w_item
    vmem = 2 * blk_bytes + w_bytes + 2 * c * 4
    vmem_limit = min(max(int(1.25 * vmem) + (2 << 20), 16 << 20), 56 << 20)

    out = pl.pallas_call(
        adaln_kernel,
        out_shape=jax.ShapeDtypeStruct((n, c), a.dtype),
        grid_spec=pltpu.PrefetchScalarGridSpec(
            num_scalar_prefetch=0,
            grid=grid,
            in_specs=[row_spec, row_spec, vec_spec, vec_spec, mat_spec],
            out_specs=row_spec,
        ),
        compiler_params=pltpu.CompilerParams(
            dimension_semantics=("parallel",),
            vmem_limit_bytes=vmem_limit,
        ),
    )(a2, s2, gamma2, bias2, w_cat)

    return out.reshape(orig_shape)


def adaln_reference(a, s, gamma_s, w_s, b_s, w_nb):
    """Pure-JAX reference mirroring the PyTorch forward."""
    a = a.astype(jnp.float32)
    s = s.astype(jnp.float32)
    mu_a = jnp.mean(a, -1, keepdims=True)
    var_a = jnp.mean((a - mu_a) ** 2, -1, keepdims=True)
    a_ln = (a - mu_a) / jnp.sqrt(var_a + LN_EPS)
    mu_s = jnp.mean(s, -1, keepdims=True)
    var_s = jnp.mean((s - mu_s) ** 2, -1, keepdims=True)
    s_ln = (s - mu_s) / jnp.sqrt(var_s + LN_EPS) * gamma_s
    gate = jax.nn.sigmoid(s_ln @ w_s + b_s)
    return gate * a_ln + s_ln @ w_nb


if __name__ == "__main__":
    # Small shapes: batch=2, seq=8, hidden (c_s)=128 (lane-friendly).
    B, L, C = 2, 8, 128
    key = jax.random.PRNGKey(0)
    k_a, k_s, k_g, k_ws, k_bs, k_wnb = jax.random.split(key, 6)

    a = jax.random.normal(k_a, (B, L, C), dtype=jnp.float32)
    s = jax.random.normal(k_s, (B, L, C), dtype=jnp.float32)

    # Deterministic synthetic parameters (shapes from nn.Module __init__).
    gamma_s = 1.0 + 0.1 * jax.random.normal(k_g, (C,), dtype=jnp.float32)    # LN(s) weight
    w_s = jax.random.normal(k_ws, (C, C), dtype=jnp.float32) * (1.0 / jnp.sqrt(C))    # Linear weight^T (in,out)
    b_s = 0.1 * jax.random.normal(k_bs, (C,), dtype=jnp.float32)             # Linear bias
    w_nb = jax.random.normal(k_wnb, (C, C), dtype=jnp.float32) * (1.0 / jnp.sqrt(C))  # LinearNoBias weight^T

    # Weight fusion hoisted out of the per-call path (param-init time).
    w_cat = fuse_adaln_weights(w_s, w_nb)  # pass mxu_bf16=True on v6e/v7x

    out = adaln_pallas(a, s, gamma_s, b_s, w_cat)
    out = jax.block_until_ready(out)
    ref = adaln_reference(a, s, gamma_s, w_s, b_s, w_nb)
    assert out.shape == (B, L, C)
    assert jnp.allclose(out, ref, atol=1e-4, rtol=1e-4), "mismatch vs reference"

    # Ragged row count (n not a multiple of the tile): exercises the
    # no-pad / masked-last-block path.
    a_r, s_r = a[:, :7, :], s[:, :7, :]
    out_r = jax.block_until_ready(adaln_pallas(a_r, s_r, gamma_s, b_s, w_cat))
    ref_r = adaln_reference(a_r, s_r, gamma_s, w_s, b_s, w_nb)
    assert out_r.shape == (B, 7, C)
    assert jnp.allclose(out_r, ref_r, atol=1e-4, rtol=1e-4), "mismatch vs reference (ragged)"

    print("KERNEL_OK")
</pallas_src>

<mosaic_0001>
module attributes {stable_mosaic.version = 11 : i64} {
  func.func @adaln_kernel(%arg0: i32, %arg1: memref<16x128xf32, #tpu.memory_space<vmem>>, %arg2: memref<16x128xf32, #tpu.memory_space<vmem>>, %arg3: memref<1x128xf32, #tpu.memory_space<vmem>>, %arg4: memref<1x128xf32, #tpu.memory_space<vmem>>, %arg5: memref<128x256xf32, #tpu.memory_space<vmem>>, %arg6: memref<16x128xf32, #tpu.memory_space<vmem>>) attributes {dimension_semantics = [#tpu.dimension_semantics<parallel>], iteration_bounds = array<i64: 1>, scalar_prefetch = 0 : i64, scratch_operands = 0 : i64, tpu.core_type = #tpu.core_type<tc>, window_params = [{transform_indices = @transform_0, window_bounds = array<i64: 16, 128>}, {transform_indices = @transform_1, window_bounds = array<i64: 16, 128>}, {pipeline_mode = #tpu.pipeline_mode<synchronous>, transform_indices = @transform_2, window_bounds = array<i64: 1, 128>}, {pipeline_mode = #tpu.pipeline_mode<synchronous>, transform_indices = @transform_3, window_bounds = array<i64: 1, 128>}, {pipeline_mode = #tpu.pipeline_mode<synchronous>, transform_indices = @transform_4, window_bounds = array<i64: 128, 256>}, {transform_indices = @transform_5, window_bounds = array<i64: 16, 128>}]} {
    %c0 = arith.constant 0 : index
    %c0_0 = arith.constant 0 : index
    %0 = vector.load %arg1[%c0, %c0_0] : memref<16x128xf32, #tpu.memory_space<vmem>>, vector<16x128xf32>
    %c0_1 = arith.constant 0 : index
    %c0_2 = arith.constant 0 : index
    %1 = vector.load %arg2[%c0_1, %c0_2] : memref<16x128xf32, #tpu.memory_space<vmem>>, vector<16x128xf32>
    %cst = arith.constant dense<0.000000e+00> : vector<16xf32>
    %2 = vector.multi_reduction <add>, %0, %cst [1] : vector<16x128xf32> to vector<16xf32>
    %3 = vector.shape_cast %2 : vector<16xf32> to vector<16x1xf32>
    %cst_3 = arith.constant 1.280000e+02 : f32
    %4 = vector.broadcast %cst_3 : f32 to vector<16x1xf32>
    %5 = arith.divf %3, %4 : vector<16x1xf32>
    %6 = vector.broadcast %5 : vector<16x1xf32> to vector<16x128xf32>
    %7 = arith.subf %0, %6 : vector<16x128xf32>
    %8 = arith.mulf %7, %7 : vector<16x128xf32>
    %cst_4 = arith.constant dense<0.000000e+00> : vector<16xf32>
    %9 = vector.multi_reduction <add>, %8, %cst_4 [1] : vector<16x128xf32> to vector<16xf32>
    %10 = vector.shape_cast %9 : vector<16xf32> to vector<16x1xf32>
    %cst_5 = arith.constant 1.280000e+02 : f32
    %11 = vector.broadcast %cst_5 : f32 to vector<16x1xf32>
    %12 = arith.divf %10, %11 : vector<16x1xf32>
    %cst_6 = arith.constant 9.99999974E-6 : f32
    %13 = vector.broadcast %cst_6 : f32 to vector<16x1xf32>
    %14 = arith.addf %12, %13 : vector<16x1xf32>
    %15 = math.rsqrt %14 : vector<16x1xf32>
    %16 = vector.broadcast %15 : vector<16x1xf32> to vector<16x128xf32>
    %17 = arith.mulf %7, %16 : vector<16x128xf32>
    %cst_7 = arith.constant dense<0.000000e+00> : vector<16xf32>
    %18 = vector.multi_reduction <add>, %1, %cst_7 [1] : vector<16x128xf32> to vector<16xf32>
    %19 = vector.shape_cast %18 : vector<16xf32> to vector<16x1xf32>
    %cst_8 = arith.constant 1.280000e+02 : f32
    %20 = vector.broadcast %cst_8 : f32 to vector<16x1xf32>
    %21 = arith.divf %19, %20 : vector<16x1xf32>
    %22 = vector.broadcast %21 : vector<16x1xf32> to vector<16x128xf32>
    %23 = arith.subf %1, %22 : vector<16x128xf32>
    %24 = arith.mulf %23, %23 : vector<16x128xf32>
    %cst_9 = arith.constant dense<0.000000e+00> : vector<16xf32>
    %25 = vector.multi_reduction <add>, %24, %cst_9 [1] : vector<16x128xf32> to vector<16xf32>
    %26 = vector.shape_cast %25 : vector<16xf32> to vector<16x1xf32>
    %cst_10 = arith.constant 1.280000e+02 : f32
    %27 = vector.broadcast %cst_10 : f32 to vector<16x1xf32>
    %28 = arith.divf %26, %27 : vector<16x1xf32>
    %cst_11 = arith.constant 9.99999974E-6 : f32
    %29 = vector.broadcast %cst_11 : f32 to vector<16x1xf32>
    %30 = arith.addf %28, %29 : vector<16x1xf32>
    %31 = math.rsqrt %30 : vector<16x1xf32>
    %32 = vector.broadcast %31 : vector<16x1xf32> to vector<16x128xf32>
    %33 = arith.mulf %23, %32 : vector<16x128xf32>
    %c0_12 = arith.constant 0 : index
    %c0_13 = arith.constant 0 : index
    %34 = vector.load %arg3[%c0_12, %c0_13] : memref<1x128xf32, #tpu.memory_space<vmem>>, vector<1x128xf32>
    %35 = vector.broadcast %34 : vector<1x128xf32> to vector<16x128xf32>
    %36 = arith.mulf %33, %35 : vector<16x128xf32>
    %c0_14 = arith.constant 0 : index
    %c0_15 = arith.constant 0 : index
    %37 = vector.load %arg5[%c0_14, %c0_15] : memref<128x256xf32, #tpu.memory_space<vmem>>, vector<128x256xf32>
    %cst_16 = arith.constant dense<0.000000e+00> : vector<16x256xf32>
    %38 = tpu.matmul %36, %37, %cst_16 {dimension_numbers = #tpu.dot_dimension_numbers<[1], [0], [0], [1], [0, 0, 1, 1], [], []>} : vector<16x128xf32>, vector<128x256xf32>, vector<16x256xf32> -> vector<16x256xf32>
    %39 = vector.extract_strided_slice %38 {offsets = [0, 0], sizes = [16, 128], strides = [1, 1]} : vector<16x256xf32> to vector<16x128xf32>
    %c0_17 = arith.constant 0 : index
    %c0_18 = arith.constant 0 : index
    %40 = vector.load %arg4[%c0_17, %c0_18] : memref<1x128xf32, #tpu.memory_space<vmem>>, vector<1x128xf32>
    %41 = vector.broadcast %40 : vector<1x128xf32> to vector<16x128xf32>
    %42 = arith.addf %39, %41 : vector<16x128xf32>
    %43 = arith.negf %42 : vector<16x128xf32>
    %44 = math.exp %43 : vector<16x128xf32>
    %cst_19 = arith.constant 1.000000e+00 : f32
    %45 = vector.broadcast %cst_19 : f32 to vector<16x128xf32>
    %46 = arith.addf %45, %44 : vector<16x128xf32>
    %47 = arith.divf %45, %46 : vector<16x128xf32>
    %48 = vector.extract_strided_slice %38 {offsets = [0, 128], sizes = [16, 128], strides = [1, 1]} : vector<16x256xf32> to vector<16x128xf32>
    %49 = arith.mulf %47, %17 : vector<16x128xf32>
    %50 = arith.addf %49, %48 : vector<16x128xf32>
    %c0_20 = arith.constant 0 : index
    %c0_21 = arith.constant 0 : index
    %51 = vector.load %arg6[%c0_20, %c0_21] : memref<16x128xf32, #tpu.memory_space<vmem>>, vector<16x128xf32>
    tpu.vector_store %arg6[%c0_20, %c0_21], %50 {strides = array<i32>} : memref<16x128xf32, #tpu.memory_space<vmem>>, vector<16x128xf32>,
    return
  }
  func.func @transform_0(%arg0: i32) -> (i32, i32) {
    %c0_i32 = arith.constant 0 : i32
    %c0_i32_0 = arith.constant 0 : i32
    return %arg0, %c0_i32 : i32, i32
  }
  func.func @transform_1(%arg0: i32) -> (i32, i32) {
    %c0_i32 = arith.constant 0 : i32
    %c0_i32_0 = arith.constant 0 : i32
    return %arg0, %c0_i32 : i32, i32
  }
  func.func @transform_2(%arg0: i32) -> (i32, i32) {
    %c0_i32 = arith.constant 0 : i32
    %c0_i32_0 = arith.constant 0 : i32
    %c0_i32_1 = arith.constant 0 : i32
    return %c0_i32, %c0_i32_0 : i32, i32
  }
  func.func @transform_3(%arg0: i32) -> (i32, i32) {
    %c0_i32 = arith.constant 0 : i32
    %c0_i32_0 = arith.constant 0 : i32
    %c0_i32_1 = arith.constant 0 : i32
    return %c0_i32, %c0_i32_0 : i32, i32
  }
  func.func @transform_4(%arg0: i32) -> (i32, i32) {
    %c0_i32 = arith.constant 0 : i32
    %c0_i32_0 = arith.constant 0 : i32
    %c0_i32_1 = arith.constant 0 : i32
    return %c0_i32, %c0_i32_0 : i32, i32
  }
  func.func @transform_5(%arg0: i32) -> (i32, i32) {
    %c0_i32 = arith.constant 0 : i32
    %c0_i32_0 = arith.constant 0 : i32
    return %arg0, %c0_i32 : i32, i32
  }
}

</mosaic_0001>

<bundles_post_ra>
// kernel: tpu_custom_call.1
= control target key start
LH: loop header
LB: loop body
LE: loop exit
PB: predicated region body
PF: predicated region fallthrough
CT: control target
= control target key end

     0   :  { %10 = vsyncpa [#allocation3], 0  ;;  %s506_s0 = inlined_call_operand.hbm [shape: f32[16,128], index: 0, kind: input, shape index: {}]   ;;  %s507_s1 = inlined_call_operand.hbm [shape: f32[16,128], index: 1, kind: input, shape index: {}]   ;;  %s508_s2 = inlined_call_operand.vmem [shape: f32[1,128], index: 2, kind: input, shape index: {}]   ;;  %s509_s3 = inlined_call_operand.vmem [shape: f32[1,128], index: 3, kind: input, shape index: {}]   ;;  %s510_s4 = inlined_call_operand.hbm [shape: f32[128,256], index: 4, kind: input, shape index: {}]   ;;  %s511_s5 = inlined_call_operand.hbm [shape: f32[16,128], index: 5, kind: output, shape index: {}]  }
   0x1   :  { %11 = vsyncpa [#allocation6], 0 }
   0x2   :  { %12 = vsyncpa [#allocation4], 0  ;;  %s421_s18 = smov [#allocation5]   ;;  %s422_s20 = smov [#allocation2]  }
   0x3   :  { %s30_s19 = sshll.u32 %s421_s18, 4  ;;  %s18_s21 = sshll.u32 %s422_s20, 4  ;;  %s31_s19 = int_to_ptr.vmem [resolvable:$true] %s30_s19  ;;  %s19_s21 = int_to_ptr.vmem [resolvable:$true] %s18_s21 }
   0x4   :  { %s343_s22 = scalar_lea.vmem %s31_s19, 256  ;;  %p348_p1 = scmp.lt.s32.totalorder %s31_s19, %s31_s19 }
   0x5   :  { %p344_p0 = scmp.ne.s32.totalorder %s31_s19, %s343_s22  ;;  %p349_p2 = scmp.lt.s32.totalorder %s343_s22, %s343_s22 }
   0x7   :  { %p350_p3 = por %p349_p2, %p348_p1 }
   0x9   :  { %p351_p4 = pnand %p350_p3, %p344_p0 }
   0xb   :  { %354 = shalt.err (!%p351_p4)
}
   0xc   :  { %s423_s23 = smov 128   ;;  %s424_s24 = smov 8  }
   0xd   :  { %36 = dma.hbm_to_vmem [thread:$0]  %s507_s1, 256, %s31_s19, [#allocation6], %s423_s23, %s423_s23, %s424_s24  }
   0xe   :  { %s363_s27 = scalar_lea.vmem %s19_s21, 256  ;;  %p368_p6 = scmp.lt.s32.totalorder %s19_s21, %s19_s21 }
   0xf   :  { %p364_p5 = scmp.ne.s32.totalorder %s19_s21, %s363_s27  ;;  %p369_p7 = scmp.lt.s32.totalorder %s363_s27, %s363_s27 }
  0x11   :  { %p370_p8 = por %p369_p7, %p368_p6 }
  0x13   :  { %p371_p9 = pnand %p370_p8, %p364_p5 }
  0x15   :  { %374 = shalt.err (!%p371_p9)
}
  0x16   :  { %24 = dma.hbm_to_vmem [thread:$0]  %s506_s0, 256, %s19_s21, [#allocation3], %s423_s23, %s423_s23, %s424_s24  }
  0x17   :  { %s425_s30 = smov [#allocation7]  }
  0x18   :  { %s46_s6 = sshll.u32 %s425_s30, 4  ;;  %s47_s6 = int_to_ptr.vmem [resolvable:$true] %s46_s6 }
  0x19   :  { %s383_s7 = scalar_lea.vmem %s47_s6, 4096  ;;  %p388_p11 = scmp.lt.s32.totalorder %s47_s6, %s47_s6 }
  0x1a   :  { %p384_p10 = scmp.ne.s32.totalorder %s47_s6, %s383_s7  ;;  %p389_p12 = scmp.lt.s32.totalorder %s383_s7, %s383_s7 }
  0x1c   :  { %p390_p13 = por %p389_p12, %p388_p11 }
  0x1e   :  { %p391_p0 = pnand %p390_p13, %p384_p10 }
  0x20   :  { %394 = shalt.err (!%p391_p0)
}
  0x21   :  { %s426_s1 = smov 256   ;;  %s427_s8 = smov 16  }
  0x22   :  { %52 = dma.hbm_to_vmem [thread:$0]  %s510_s4, 4096, %s47_s6, [#allocation6], %s426_s1, %s426_s1, %s427_s8  }
  0x23   :  { %415 = dma.done.wait [#allocation3], 256  }
  0x24   :  { %416 = vsyncadd [#allocation3], 4294967040 }
  0x25   :  { %417 = dma.done.wait [#allocation6], 4352  }
  0x26   :  { %418 = vsyncadd [#allocation6], 4294962944  ;;  %v64_v0 = vld [vmem:[#allocation5] sm:$0xff]  ;;  %v65_v1 = vld [vmem:[#allocation5 + $0x8] sm:$0xff]  ;;  %v428_v48 = vmov 0.0  }
  0x27   :  { %89 = vadd.xlane.f32.xlu0 %v64_v0  ;;  %v62_v2 = vld [vmem:[#allocation2] sm:$0xff]  ;;  %v151_v3 = vld [vmem:[#allocation7 + $0xf8] sm:$0xff]  ;;  %v150_v4 = vld [vmem:[#allocation7 + $0xf0] sm:$0xff]  ;;  %216 = vmatprep.mubr.f32.mxu0 %v428_v48 }
  0x28   :  { %v149_v5 = vld [vmem:[#allocation7 + $0xe8] sm:$0xff]  ;;  %152 = vmatprep.subr.mxu0 %v151_v3  ;;  %v148_v6 = vld [vmem:[#allocation7 + $0xe0] sm:$0xff]  ;;  %278 = vmatprep.subr.mxu1 %v151_v3  ;;  %v147_v7 = vld [vmem:[#allocation7 + $0xd8] sm:$0xff] }
  0x29   :  { %153 = vmatpush1.msra.mxu0 %v150_v4  ;;  %294 = vmatpush1.msra.mxu1 %v150_v4  ;;  %v146_v8 = vld [vmem:[#allocation7 + $0xd0] sm:$0xff]  ;;  %v145_v9 = vld [vmem:[#allocation7 + $0xc8] sm:$0xff]  ;;  %v144_v10 = vld [vmem:[#allocation7 + $0xc0] sm:$0xff] }
  0x2a   :  { %154 = vmatprep.subr.mxu0 %v149_v5  ;;  %279 = vmatprep.subr.mxu1 %v149_v5  ;;  %v143_v11 = vld [vmem:[#allocation7 + $0xb8] sm:$0xff]  ;;  %v142_v12 = vld [vmem:[#allocation7 + $0xb0] sm:$0xff]  ;;  %v485_v24 = vld [vmem:[#allocation2 + $0x8] sm:$0xff] }
  0x2b   :  { %91 = vadd.xlane.f32.xlu0 %v65_v1  ;;  %155 = vmatpush1.msra.mxu0 %v148_v6  ;;  %v141_v26 = vld [vmem:[#allocation7 + $0xa8] sm:$0xff]  ;;  %v140_v27 = vld [vmem:[#allocation7 + $0xa0] sm:$0xff]  ;;  %v139_v28 = vld [vmem:[#allocation7 + $0x98] sm:$0xff] }
  0x2c   :  { %295 = vmatpush1.msra.mxu1 %v148_v6  ;;  %156 = vmatprep.subr.mxu0 %v147_v7  ;;  %v138_v29 = vld [vmem:[#allocation7 + $0x90] sm:$0xff]  ;;  %v137_v30 = vld [vmem:[#allocation7 + $0x88] sm:$0xff]  ;;  %v136_v31 = vld [vmem:[#allocation7 + $0x80] sm:$0xff] }
  0x2d   :  { %280 = vmatprep.subr.mxu1 %v147_v7  ;;  %157 = vmatpush1.msra.mxu0 %v146_v8  ;;  %v135_v32 = vld [vmem:[#allocation7 + $0x78] sm:$0xff]  ;;  %v134_v33 = vld [vmem:[#allocation7 + $0x70] sm:$0xff]  ;;  %v133_v34 = vld [vmem:[#allocation7 + $0x68] sm:$0xff] }
  0x2e   :  { %296 = vmatpush1.msra.mxu1 %v146_v8  ;;  %158 = vmatprep.subr.mxu0 %v145_v9  ;;  %v132_v35 = vld [vmem:[#allocation7 + $0x60] sm:$0xff]  ;;  %v131_v36 = vld [vmem:[#allocation7 + $0x58] sm:$0xff]  ;;  %v130_v37 = vld [vmem:[#allocation7 + $0x50] sm:$0xff] }
  0x2f   :  { %66 = vadd.xlane.f32.xlu0 %v62_v2  ;;  %281 = vmatprep.subr.mxu1 %v145_v9  ;;  %v129_v38 = vld [vmem:[#allocation7 + $0x48] sm:$0xff]  ;;  %v128_v39 = vld [vmem:[#allocation7 + $0x40] sm:$0xff]  ;;  %v127_v40 = vld [vmem:[#allocation7 + $0x38] sm:$0xff] }
  0x30   :  { %159 = vmatpush1.msra.mxu0 %v144_v10  ;;  %297 = vmatpush1.msra.mxu1 %v144_v10  ;;  %v126_v41 = vld [vmem:[#allocation7 + $0x30] sm:$0xff]  ;;  %v125_v42 = vld [vmem:[#allocation7 + $0x28] sm:$0xff]  ;;  %v124_v43 = vld [vmem:[#allocation7 + $0x20] sm:$0xff] }
  0x31   :  { %160 = vmatprep.subr.mxu0 %v143_v11  ;;  %282 = vmatprep.subr.mxu1 %v143_v11  ;;  %v123_v44 = vld [vmem:[#allocation7 + $0x18] sm:$0xff]  ;;  %v122_v45 = vld [vmem:[#allocation7 + $0x10] sm:$0xff]  ;;  %v121_v46 = vld [vmem:[#allocation7 + $0x8] sm:$0xff] }
  0x32   :  { %161 = vmatpush1.msra.mxu0 %v142_v12  ;;  %298 = vmatpush1.msra.mxu1 %v142_v12  ;;  %v120_v47 = vld [vmem:[#allocation7] sm:$0xff] }
  0x33   :  { %162 = vmatprep.subr.mxu0 %v141_v26  ;;  %283 = vmatprep.subr.mxu1 %v141_v26  ;;  %v274_v60 = vld [vmem:[%s508_s2] ss:$0 sm:$0xff]  ;;  %s429_s2 = smov [#allocation8]  }
  0x34   :  { %163 = vmatpush1.msra.mxu0 %v140_v27  ;;  %299 = vmatpush1.msra.mxu1 %v140_v27 }
  0x35   :  { %164 = vmatprep.subr.mxu0 %v139_v28  ;;  %284 = vmatprep.subr.mxu1 %v139_v28 }
  0x36   :  { %165 = vmatpush1.msra.mxu0 %v138_v29  ;;  %300 = vmatpush1.msra.mxu1 %v138_v29 }
  0x37   :  { %166 = vmatprep.subr.mxu0 %v137_v30  ;;  %285 = vmatprep.subr.mxu1 %v137_v30 }
  0x38   :  { %167 = vmatpush1.msra.mxu0 %v136_v31  ;;  %301 = vmatpush1.msra.mxu1 %v136_v31 }
  0x39   :  { %168 = vmatprep.subr.mxu0 %v135_v32  ;;  %286 = vmatprep.subr.mxu1 %v135_v32 }
  0x3a   :  { %169 = vmatpush1.msra.mxu0 %v134_v33  ;;  %302 = vmatpush1.msra.mxu1 %v134_v33 }
  0x3b   :  { %170 = vmatprep.subr.mxu0 %v133_v34  ;;  %287 = vmatprep.subr.mxu1 %v133_v34 }
  0x3c   :  { %171 = vmatpush1.msra.mxu0 %v132_v35  ;;  %303 = vmatpush1.msra.mxu1 %v132_v35 }
  0x3d   :  { %172 = vmatprep.subr.mxu0 %v131_v36  ;;  %288 = vmatprep.subr.mxu1 %v131_v36 }
  0x3e   :  { %173 = vmatpush1.msra.mxu0 %v130_v37  ;;  %304 = vmatpush1.msra.mxu1 %v130_v37 }
  0x3f   :  { %174 = vmatprep.subr.mxu0 %v129_v38  ;;  %289 = vmatprep.subr.mxu1 %v129_v38 }
  0x40   :  { %175 = vmatpush1.msra.mxu0 %v128_v39  ;;  %305 = vmatpush1.msra.mxu1 %v128_v39 }
  0x41   :  { %176 = vmatprep.subr.mxu0 %v127_v40  ;;  %290 = vmatprep.subr.mxu1 %v127_v40 }
  0x42   :  { %177 = vmatpush1.msra.mxu0 %v126_v41  ;;  %306 = vmatpush1.msra.mxu1 %v126_v41 }
  0x43   :  { %178 = vmatprep.subr.mxu0 %v125_v42  ;;  %291 = vmatprep.subr.mxu1 %v125_v42 }
  0x44   :  { %179 = vmatpush1.msra.mxu0 %v124_v43  ;;  %307 = vmatpush1.msra.mxu1 %v124_v43 }
  0x45   :  { %180 = vmatprep.subr.mxu0 %v123_v44  ;;  %292 = vmatprep.subr.mxu1 %v123_v44 }
  0x46   :  { %181 = vmatpush1.msra.mxu0 %v122_v45  ;;  %308 = vmatpush1.msra.mxu1 %v122_v45 }
  0x47   :  { %182 = vmatprep.subr.mxu0 %v121_v46  ;;  %293 = vmatprep.subr.mxu1 %v121_v46 }
  0x48   :  { %183 = vmatpush1.msra.mxu0 %v120_v47  ;;  %309 = vmatpush1.msra.mxu1 %v120_v47 }
  0x49   :  { %222 = vmatprep.mubr.f32.mxu1 %v428_v48 }
  0xb0   :  { %v90_v13 = vpop.xlane.xlu0 %89 }
  0xb1   :  { %v93_v14 = vmul.f32 0.0078125, %v90_v13 }
  0xb3   :  { %v475_v15 = vsub.f32 %v64_v0, %v93_v14 }
  0xb4   :  { %v92_v16 = vpop.xlane.xlu0 %91 }
  0xb5   :  { %v94_v17 = vmul.f32 0.0078125, %v92_v16  ;;  %v97_v18 = vmul.f32 %v475_v15, %v475_v15 }
  0xb7   :  { %v479_v19 = vsub.f32 %v65_v1, %v94_v17  ;;  %99 = vadd.xlane.f32.xlu1 %v97_v18 }
  0xb8   :  { %v67_v20 = vpop.xlane.xlu0 %66 }
  0xb9   :  { %v98_v21 = vmul.f32 %v479_v19, %v479_v19  ;;  %v71_v22 = vmul.f32 0.0078125, %v67_v20 }
  0xbb   :  { %101 = vadd.xlane.f32.xlu1 %v98_v21  ;;  %v483_v23 = vsub.f32 %v62_v2, %v71_v22  ;;  %v275_v2 = vld [vmem:[%s509_s3] ss:$0 sm:$0xff]  ;;  %s261_s3 = sshll.u32 %s429_s2, 4  ;;  %s262_s3 = int_to_ptr.vmem [resolvable:$true] %s261_s3 }
  0xbc   :  { %s395_s13 = scalar_lea.vmem %s262_s3, 256  ;;  %p400_p2 = scmp.lt.s32.totalorder %s262_s3, %s262_s3 }
  0xbd   :  { %v75_v25 = vmul.f32 %v483_v23, %v483_v23  ;;  %p396_p1 = scmp.ne.s32.totalorder %s262_s3, %s395_s13  ;;  %p401_p3 = scmp.lt.s32.totalorder %s395_s13, %s395_s13 }
  0xbf   :  { %68 = vadd.xlane.f32.xlu1 %v485_v24  ;;  %77 = vadd.xlane.f32.xlu0 %v75_v25  ;;  %p402_p4 = por %p401_p3, %p400_p2 }
  0xc1   :  { %p403_p5 = pnand %p402_p4, %p396_p1 }
 0x140   :  { %v100_v49 = vpop.xlane.xlu1 %99 }
 0x141   :  { %v103_v50 = vmul.f32 0.0078125, %v100_v49 }
 0x143   :  { %v105_v51 = vadd.f32 1e-05, %v103_v50 }
 0x144   :  { %v102_v52 = vpop.xlane.xlu1 %101 }
 0x145   :  { %319 = vrsqrt.f32 %v105_v51  ;;  %v104_v53 = vmul.f32 0.0078125, %v102_v52 }
 0x147   :  { %v106_v54 = vadd.f32 1e-05, %v104_v53 }
 0x148   :  { %v69_v55 = vpop.xlane.xlu1 %68  ;;  %v78_v8 = vpop.xlane.xlu0 %77 }
 0x149   :  { %321 = vrsqrt.f32 %v106_v54  ;;  %v72_v56 = vmul.f32 0.0078125, %v69_v55  ;;  %v81_v10 = vmul.f32 0.0078125, %v78_v8 }
 0x14b   :  { %v74_v57 = vsub.f32 %v485_v24, %v72_v56  ;;  %v83_v13 = vadd.f32 1e-05, %v81_v10 }
 0x14d   :  { %v76_v58 = vmul.f32 %v74_v57, %v74_v57 }
 0x14f   :  { %79 = vadd.xlane.f32.xlu1 %v76_v58 }
 0x152   :  { %v320_v59 = vpop.eup %319 }
 0x153   :  { %v109_v61 = vmul.f32 %v320_v59, %v475_v15 }
 0x155   :  { %v118_v62 = vmul.f32 %v274_v60, %v109_v61 }
 0x156   :  { %v322_v63 = vpop.eup %321 }
 0x157   :  { %217 = vmatmul.mubr.f32.vlgmr.msra.gmra.mxu0 %v118_v62  ;;  %v110_v0 = vmul.f32 %v322_v63, %v479_v19 }
 0x159   :  { %v119_v1 = vmul.f32 %v274_v60, %v110_v0 }
 0x15b   :  { %223 = vmatmul.mubr.f32.vlgmr.msra.gmra.mxu1 %v119_v1 }
 0x1d8   :  { %v80_v11 = vpop.xlane.xlu1 %79 }
 0x1d9   :  { %v82_v12 = vmul.f32 0.0078125, %v80_v11 }
 0x1db   :  { %v84_v14 = vadd.f32 1e-05, %v82_v12 }
 0x217   :  { %v218_v3 = vpop.f32.mrf.mxu0 }
 0x218   :  { %v236_v4 = vadd.f32 %v275_v2, %v218_v3 }
 0x219   :  { %v220_v25 = vpop.f32.mrf.mxu0 }
 0x21a   :  { %v276_v5 = vmul.f32 -1.442695, %v236_v4 }
 0x21b   :  { %v224_v6 = vpop.f32.mrf.mxu1 }
 0x21c   :  { %323 = vpow2.f32 %v276_v5  ;;  %v237_v7 = vadd.f32 %v275_v2, %v224_v6 }
 0x21d   :  { %v226_v30 = vpop.f32.mrf.mxu1 }
 0x21e   :  { %v277_v9 = vmul.f32 -1.442695, %v237_v7 }
 0x220   :  { %325 = vpow2.f32 %v277_v9 }
 0x221   :  { %327 = vrsqrt.f32 %v83_v13 }
 0x222   :  { %329 = vrsqrt.f32 %v84_v14 }
 0x229   :  { %v324_v15 = vpop.eup %323 }
 0x22a   :  { %v244_v16 = vadd.f32 1.0, %v324_v15 }
 0x22c   :  { %331 = vrcp.f32 %v244_v16 }
 0x22d   :  { %v326_v17 = vpop.eup %325 }
 0x22e   :  { %v245_v18 = vadd.f32 1.0, %v326_v17  ;;  %v328_v19 = vpop.eup %327 }
 0x22f   :  { %v330_v20 = vpop.eup %329  ;;  %v87_v21 = vmul.f32 %v328_v19, %v483_v23 }
 0x230   :  { %333 = vrcp.f32 %v245_v18  ;;  %v88_v27 = vmul.f32 %v330_v20, %v74_v57 }
 0x239   :  { %v332_v22 = vpop.eup %331 }
 0x23a   :  { %v250_v24 = vmul.f32 %v332_v22, %v87_v21 }
 0x23c   :  { %v252_v26 = vadd.f32 %v250_v24, %v220_v25 }
 0x23d   :  { %v334_v28 = vpop.eup %333 }
 0x23e   :  { %254 = vst [vmem:[#allocation8] sm:$0xff] %v252_v26  ;;  %v251_v29 = vmul.f32 %v334_v28, %v88_v27 }
 0x240   :  { %v253_v31 = vadd.f32 %v251_v29, %v226_v30 }
 0x242   :  { %255 = vst [vmem:[#allocation8 + $0x8] sm:$0xff] %v253_v31 }
 0x243   :  { %406 = shalt.err (!%p403_p5)
}
 0x244   :  { %267 = dma.vmem_to_hbm [thread:$0]  %s262_s3, 256, %s511_s5, [#allocation4], %s423_s23, %s423_s23, %s424_s24  }
 0x245   :  { %419 = dma.done.wait [#allocation4], 256  }
 0x246   :  { %420 = vsyncadd [#allocation4], 4294967040 }
 0x247   :  { %271 = vsyncpa [#allocation3], 1 }
 0x248   :  { %272 = vsyncpa [#allocation6], 1 }
 0x249   :  { %273 = vsyncpa [#allocation4], 1 }

</bundles_post_ra>
